<compile_context>
chip_gen: v5e
topology: v5e:2x2
jax: 0.10.0
libtpu: 0.0.40
codegen_flags: <defaults>
</compile_context>

<pallas_src>
import functools

import jax
import jax.numpy as jnp
from jax.experimental import pallas as pl
from jax.experimental.pallas import tpu as pltpu

_LANE = 128   # lane width (last dim)
_SUB = 8      # f32 sublane width (second-to-last dim)


def _round_up(n, m):
    return ((n + m - 1) // m) * m


def _pad2(x, shape):
    """Zero-pad a 2-D array up to `shape` (no-op if already that shape)."""
    pr = shape[0] - x.shape[0]
    pc = shape[1] - x.shape[1]
    if pr == 0 and pc == 0:
        return x
    return jnp.pad(x, ((0, pr), (0, pc)))


def _mlp_kernel(xe_ref, xl_ref, w1e_ref, w1l_ref, b1_ref, w2_ref, b2_ref, o_ref):
    # Layer 1: two MXU partials (embeddings + low-freq phase), bf16 in / f32 acc.
    h = jnp.dot(xe_ref[...], w1e_ref[...], preferred_element_type=jnp.float32)
    h = h + jnp.dot(xl_ref[...], w1l_ref[...], preferred_element_type=jnp.float32)
    # Epilogue in f32 on the VPU: bias (broadcast from (1, HP)) + ReLU.
    h = jnp.maximum(h + b1_ref[...], 0.0)
    # Layer 2: cast the f32 hidden back to the weight dtype (bf16) for the MXU,
    # accumulate in f32, lane-dense (padded) output.
    y = jnp.dot(h.astype(w2_ref.dtype), w2_ref[...],
                preferred_element_type=jnp.float32)
    o_ref[...] = (y + b2_ref[...]).astype(o_ref.dtype)


@functools.partial(jax.jit, static_argnames=("crop_size",))
def bfc_mlp_pallas(phase, combined_embeddings, params, crop_size):
    """Forward pass of BFC_MLP.

    phase:                [B, H, W] float32
    combined_embeddings:  [B, 1024] float32
    params: dict with w1 [1024 + crop^2, hidden], b1 [hidden],
            w2 [hidden, num_classes], b2 [num_classes]
    """
    B, H, W = phase.shape

    # extract_low_frequency: center crop of crop_size x crop_size, flattened.
    ch, cw = H // 2, W // 2
    sh, sw = ch - crop_size // 2, cw - crop_size // 2
    low_freq = phase[:, sh:sh + crop_size, sw:sw + crop_size].reshape(B, -1)

    emb_dim = combined_embeddings.shape[1]
    lf_dim = low_freq.shape[1]

    w1 = params["w1"]
    b1 = params["b1"]
    w2 = params["w2"]
    b2 = params["b2"]
    hidden = w1.shape[1]
    num_classes = w2.shape[1]

    # Split w1 so the concat is fused into the kernel as two partial dots.
    w1_emb = w1[:emb_dim, :]
    w1_lf = w1[emb_dim:, :]

    # Lane-aligned contraction / output dims (zero-filled padding => padded
    # K-rows / hidden-lanes / class-lanes contribute exactly zero).
    KE = _round_up(emb_dim, _LANE)
    KL = _round_up(lf_dim, _LANE)
    HP = _round_up(hidden, _LANE)
    CP = _round_up(num_classes, _LANE)

    # Batch tile: as big as the batch (up to 512 rows), sublane-aligned.  The
    # batch itself is NOT padded; Pallas masks the ragged last block.
    TB = min(_round_up(B, _SUB), 512)
    # v7x has 2 TensorCores: make sure the "parallel" batch axis has >= 2 grid
    # steps when the batch is big enough to split (no-op on v5e/v6e).
    if B > _SUB and pl.cdiv(B, TB) < 2:
        TB = _round_up(pl.cdiv(B, 2), _SUB)
    grid_b = pl.cdiv(B, TB)

    # bf16 feed for the MXU (halves HBM traffic); f32 accumulation + epilogue.
    mxu_dtype = jnp.bfloat16
    xe = _pad2(combined_embeddings, (B, KE)).astype(mxu_dtype)
    xl = _pad2(low_freq, (B, KL)).astype(mxu_dtype)
    w1e = _pad2(w1_emb, (KE, HP)).astype(mxu_dtype)
    w1l = _pad2(w1_lf, (KL, HP)).astype(mxu_dtype)
    w2p = _pad2(w2, (HP, CP)).astype(mxu_dtype)
    b1p = _pad2(b1.reshape(1, -1), (1, HP))          # f32 epilogue
    b2p = _pad2(b2.reshape(1, -1), (1, CP))          # f32 epilogue

    # Advisory cost hint for XLA scheduling around the custom call.
    flops = 2 * B * (KE + KL) * HP + 2 * B * HP * CP
    bytes_accessed = (
        B * (KE + KL) * 2                    # bf16 activations in
        + ((KE + KL) * HP + HP * CP) * 2     # bf16 weights
        + (HP + CP) * 4                      # f32 biases
        + B * CP * 4                         # f32 output
    )
    cost = pl.CostEstimate(flops=flops, transcendentals=0,
                           bytes_accessed=bytes_accessed)

    # Explicit scoped-VMEM budget: double-buffered activation/output tiles plus
    # the (default double-buffered) resident weights, with headroom; capped so
    # it stays inside v7x's 64 MiB physical VMEM.
    vmem_bytes = (
        2 * TB * (KE + KL) * 2          # activation tiles (bf16, 2 buffers)
        + 2 * TB * CP * 4               # output tile (f32, 2 buffers)
        + 2 * ((KE + KL) * HP + HP * CP) * 2   # weights (bf16, 2 buffers)
        + 2 * (HP + CP) * 4             # biases
    )
    vmem_limit = max(16 << 20, min(int(vmem_bytes * 1.5) + (2 << 20), 64 << 20))

    out_padded = pl.pallas_call(
        _mlp_kernel,
        out_shape=jax.ShapeDtypeStruct((B, CP), jnp.float32),
        grid_spec=pltpu.PrefetchScalarGridSpec(
            num_scalar_prefetch=0,
            grid=(grid_b,),
            in_specs=[
                # Activations: tiled over the batch grid axis (ragged tail OK:
                # rows are independent, tail store is masked).
                pl.BlockSpec((TB, KE), lambda i: (i, 0)),   # embeddings tile
                pl.BlockSpec((TB, KL), lambda i: (i, 0)),   # low-freq tile
                # Weights / biases: same block every step -> VMEM resident.
                pl.BlockSpec((KE, HP), lambda i: (0, 0)),   # w1_emb
                pl.BlockSpec((KL, HP), lambda i: (0, 0)),   # w1_lf
                pl.BlockSpec((1, HP), lambda i: (0, 0)),    # b1
                pl.BlockSpec((HP, CP), lambda i: (0, 0)),   # w2
                pl.BlockSpec((1, CP), lambda i: (0, 0)),    # b2
            ],
            out_specs=pl.BlockSpec((TB, CP), lambda i: (i, 0)),
        ),
        compiler_params=pltpu.CompilerParams(
            dimension_semantics=("parallel",),
            vmem_limit_bytes=vmem_limit,
        ),
        cost_estimate=cost,
    )(xe, xl, w1e, w1l, b1p, w2p, b2p)

    # Strip the class-lane padding before returning (batch is already exact).
    return out_padded[:, :num_classes]


def init_params(key, in_dim, hidden_dim, num_classes):
    """Deterministic parameter init (PyTorch-style uniform fan-in bounds)."""
    k1, k2, k3, k4 = jax.random.split(key, 4)
    bound1 = 1.0 / jnp.sqrt(in_dim)
    bound2 = 1.0 / jnp.sqrt(hidden_dim)
    return {
        "w1": jax.random.uniform(k1, (in_dim, hidden_dim), jnp.float32, -bound1, bound1),
        "b1": jax.random.uniform(k2, (hidden_dim,), jnp.float32, -bound1, bound1),
        "w2": jax.random.uniform(k3, (hidden_dim, num_classes), jnp.float32, -bound2, bound2),
        "b2": jax.random.uniform(k4, (num_classes,), jnp.float32, -bound2, bound2),
    }


if __name__ == "__main__":
    # Small shapes consistent with the module's forward:
    #   phase: [B, H, W], combined_embeddings: [B, 512*2]
    B = 2
    Hs, Ws = 32, 32
    crop_size = 16
    hidden_dim = 32
    num_classes = 8
    embed_dim = 512 * 2
    in_dim = embed_dim + crop_size * crop_size

    key = jax.random.PRNGKey(0)
    k_phase, k_emb, k_params = jax.random.split(key, 3)

    phase = jax.random.normal(k_phase, (B, Hs, Ws), jnp.float32)
    combined_embeddings = jax.random.normal(k_emb, (B, embed_dim), jnp.float32)
    params = init_params(k_params, in_dim, hidden_dim, num_classes)

    out = bfc_mlp_pallas(phase, combined_embeddings, params, crop_size)
    jax.block_until_ready(out)

    # Reference check in plain JAX (same math as the PyTorch module, full f32).
    ch, cw = Hs // 2, Ws // 2
    sh, sw = ch - crop_size // 2, cw - crop_size // 2
    low = phase[:, sh:sh + crop_size, sw:sw + crop_size].reshape(B, -1)
    x_ref = jnp.concatenate([combined_embeddings, low], axis=1)
    h_ref = jnp.maximum(x_ref @ params["w1"] + params["b1"], 0.0)
    y_ref = h_ref @ params["w2"] + params["b2"]
    assert out.shape == (B, num_classes)
    # Tolerance loosened for the bf16 MXU feed (f32 accumulation kept).
    assert jnp.allclose(out, y_ref, atol=5e-2, rtol=5e-2), (
        f"max abs err {jnp.max(jnp.abs(out - y_ref))}")

    print("KERNEL_OK")
</pallas_src>

<mosaic_0001>
module attributes {stable_mosaic.version = 11 : i64} {
  func.func @_mlp_kernel(%arg0: i32, %arg1: memref<8x1024xbf16, #tpu.memory_space<vmem>>, %arg2: memref<8x256xbf16, #tpu.memory_space<vmem>>, %arg3: memref<1024x128xbf16, #tpu.memory_space<vmem>>, %arg4: memref<256x128xbf16, #tpu.memory_space<vmem>>, %arg5: memref<1x128xf32, #tpu.memory_space<vmem>>, %arg6: memref<128x128xbf16, #tpu.memory_space<vmem>>, %arg7: memref<1x128xf32, #tpu.memory_space<vmem>>, %arg8: memref<8x128xf32, #tpu.memory_space<vmem>>) attributes {dimension_semantics = [#tpu.dimension_semantics<parallel>], iteration_bounds = array<i64: 1>, scalar_prefetch = 0 : i64, scratch_operands = 0 : i64, tpu.core_type = #tpu.core_type<tc>, window_params = [{transform_indices = @transform_0, window_bounds = array<i64: 8, 1024>}, {transform_indices = @transform_1, window_bounds = array<i64: 8, 256>}, {pipeline_mode = #tpu.pipeline_mode<synchronous>, transform_indices = @transform_2, window_bounds = array<i64: 1024, 128>}, {pipeline_mode = #tpu.pipeline_mode<synchronous>, transform_indices = @transform_3, window_bounds = array<i64: 256, 128>}, {pipeline_mode = #tpu.pipeline_mode<synchronous>, transform_indices = @transform_4, window_bounds = array<i64: 1, 128>}, {pipeline_mode = #tpu.pipeline_mode<synchronous>, transform_indices = @transform_5, window_bounds = array<i64: 128, 128>}, {pipeline_mode = #tpu.pipeline_mode<synchronous>, transform_indices = @transform_6, window_bounds = array<i64: 1, 128>}, {transform_indices = @transform_7, window_bounds = array<i64: 8, 128>}]} {
    %c0 = arith.constant 0 : index
    %c0_0 = arith.constant 0 : index
    %0 = vector.load %arg1[%c0, %c0_0] : memref<8x1024xbf16, #tpu.memory_space<vmem>>, vector<8x1024xbf16>
    %c0_1 = arith.constant 0 : index
    %c0_2 = arith.constant 0 : index
    %1 = vector.load %arg3[%c0_1, %c0_2] : memref<1024x128xbf16, #tpu.memory_space<vmem>>, vector<1024x128xbf16>
    %cst = arith.constant dense<0.000000e+00> : vector<8x128xf32>
    %2 = tpu.matmul %0, %1, %cst {dimension_numbers = #tpu.dot_dimension_numbers<[1], [0], [0], [1], [0, 0, 1, 1], [], []>} : vector<8x1024xbf16>, vector<1024x128xbf16>, vector<8x128xf32> -> vector<8x128xf32>
    %c0_3 = arith.constant 0 : index
    %c0_4 = arith.constant 0 : index
    %3 = vector.load %arg2[%c0_3, %c0_4] : memref<8x256xbf16, #tpu.memory_space<vmem>>, vector<8x256xbf16>
    %c0_5 = arith.constant 0 : index
    %c0_6 = arith.constant 0 : index
    %4 = vector.load %arg4[%c0_5, %c0_6] : memref<256x128xbf16, #tpu.memory_space<vmem>>, vector<256x128xbf16>
    %cst_7 = arith.constant dense<0.000000e+00> : vector<8x128xf32>
    %5 = tpu.matmul %3, %4, %cst_7 {dimension_numbers = #tpu.dot_dimension_numbers<[1], [0], [0], [1], [0, 0, 1, 1], [], []>} : vector<8x256xbf16>, vector<256x128xbf16>, vector<8x128xf32> -> vector<8x128xf32>
    %6 = arith.addf %2, %5 : vector<8x128xf32>
    %c0_8 = arith.constant 0 : index
    %c0_9 = arith.constant 0 : index
    %7 = vector.load %arg5[%c0_8, %c0_9] : memref<1x128xf32, #tpu.memory_space<vmem>>, vector<1x128xf32>
    %8 = vector.broadcast %7 : vector<1x128xf32> to vector<8x128xf32>
    %9 = arith.addf %6, %8 : vector<8x128xf32>
    %cst_10 = arith.constant 0.000000e+00 : f32
    %10 = vector.broadcast %cst_10 : f32 to vector<8x128xf32>
    %11 = arith.maximumf %9, %10 : vector<8x128xf32>
    %12 = arith.truncf %11 : vector<8x128xf32> to vector<8x128xbf16>
    %c0_11 = arith.constant 0 : index
    %c0_12 = arith.constant 0 : index
    %13 = vector.load %arg6[%c0_11, %c0_12] : memref<128x128xbf16, #tpu.memory_space<vmem>>, vector<128x128xbf16>
    %cst_13 = arith.constant dense<0.000000e+00> : vector<8x128xf32>
    %14 = tpu.matmul %12, %13, %cst_13 {dimension_numbers = #tpu.dot_dimension_numbers<[1], [0], [0], [1], [0, 0, 1, 1], [], []>} : vector<8x128xbf16>, vector<128x128xbf16>, vector<8x128xf32> -> vector<8x128xf32>
    %c0_14 = arith.constant 0 : index
    %c0_15 = arith.constant 0 : index
    %15 = vector.load %arg7[%c0_14, %c0_15] : memref<1x128xf32, #tpu.memory_space<vmem>>, vector<1x128xf32>
    %16 = vector.broadcast %15 : vector<1x128xf32> to vector<8x128xf32>
    %17 = arith.addf %14, %16 : vector<8x128xf32>
    %c0_16 = arith.constant 0 : index
    %c0_17 = arith.constant 0 : index
    %18 = vector.load %arg8[%c0_16, %c0_17] : memref<8x128xf32, #tpu.memory_space<vmem>>, vector<8x128xf32>
    tpu.vector_store %arg8[%c0_16, %c0_17], %17 {strides = array<i32>} : memref<8x128xf32, #tpu.memory_space<vmem>>, vector<8x128xf32>,
    return
  }
  func.func @transform_0(%arg0: i32) -> (i32, i32) {
    %c0_i32 = arith.constant 0 : i32
    %c0_i32_0 = arith.constant 0 : i32
    return %arg0, %c0_i32 : i32, i32
  }
  func.func @transform_1(%arg0: i32) -> (i32, i32) {
    %c0_i32 = arith.constant 0 : i32
    %c0_i32_0 = arith.constant 0 : i32
    return %arg0, %c0_i32 : i32, i32
  }
  func.func @transform_2(%arg0: i32) -> (i32, i32) {
    %c0_i32 = arith.constant 0 : i32
    %c0_i32_0 = arith.constant 0 : i32
    %c0_i32_1 = arith.constant 0 : i32
    return %c0_i32, %c0_i32_0 : i32, i32
  }
  func.func @transform_3(%arg0: i32) -> (i32, i32) {
    %c0_i32 = arith.constant 0 : i32
    %c0_i32_0 = arith.constant 0 : i32
    %c0_i32_1 = arith.constant 0 : i32
    return %c0_i32, %c0_i32_0 : i32, i32
  }
  func.func @transform_4(%arg0: i32) -> (i32, i32) {
    %c0_i32 = arith.constant 0 : i32
    %c0_i32_0 = arith.constant 0 : i32
    %c0_i32_1 = arith.constant 0 : i32
    return %c0_i32, %c0_i32_0 : i32, i32
  }
  func.func @transform_5(%arg0: i32) -> (i32, i32) {
    %c0_i32 = arith.constant 0 : i32
    %c0_i32_0 = arith.constant 0 : i32
    %c0_i32_1 = arith.constant 0 : i32
    return %c0_i32, %c0_i32_0 : i32, i32
  }
  func.func @transform_6(%arg0: i32) -> (i32, i32) {
    %c0_i32 = arith.constant 0 : i32
    %c0_i32_0 = arith.constant 0 : i32
    %c0_i32_1 = arith.constant 0 : i32
    return %c0_i32, %c0_i32_0 : i32, i32
  }
  func.func @transform_7(%arg0: i32) -> (i32, i32) {
    %c0_i32 = arith.constant 0 : i32
    %c0_i32_0 = arith.constant 0 : i32
    return %arg0, %c0_i32 : i32, i32
  }
}

</mosaic_0001>

<bundles_post_ra>
// kernel: bfc_mlp_pallas.1
= control target key start
LH: loop header
LB: loop body
LE: loop exit
PB: predicated region body
PF: predicated region fallthrough
CT: control target
= control target key end

     0   :  { %12 = vsyncpa [#allocation3], 0  ;;  %s1765_s0 = inlined_call_operand.vmem [shape: bf16[2,1024], index: 0, kind: input, shape index: {}]   ;;  %s1766_s1 = inlined_call_operand.vmem [shape: bf16[2,256], index: 1, kind: input, shape index: {}]   ;;  %s1767_s2 = inlined_call_operand.vmem [shape: bf16[1024,128], index: 2, kind: input, shape index: {}]   ;;  %s1768_s3 = inlined_call_operand.vmem [shape: bf16[256,128], index: 3, kind: input, shape index: {}]   ;;  %s1769_s4 = inlined_call_operand.vmem [shape: f32[1,128], index: 4, kind: input, shape index: {}]   ;;  %s1770_s5 = inlined_call_operand.vmem [shape: bf16[128,128], index: 5, kind: input, shape index: {}]   ;;  %s1771_s6 = inlined_call_operand.vmem [shape: f32[1,128], index: 6, kind: input, shape index: {}]   ;;  %s1772_s7 = inlined_call_operand.hbm [shape: f32[2,128], index: 7, kind: output, shape index: {}]  }
   0x1   :  { %v1377_v0 = vld [vmem:[%s1768_s3 + $0x38] sm:$0xff]  ;;  %v1376_v4 = vld [vmem:[%s1768_s3 + $0x30] sm:$0xff]  ;;  %v1375_v8 = vld [vmem:[%s1768_s3 + $0x28] sm:$0xff] }
   0x2   :  { %v1385_v1 = vld [vmem:[%s1768_s3 + $0x78] sm:$0xff]  ;;  %306 = vmatpush.bf16.msra.mxu0 %v1377_v0  ;;  %v1384_v5 = vld [vmem:[%s1768_s3 + $0x70] sm:$0xff]  ;;  %v1383_v9 = vld [vmem:[%s1768_s3 + $0x68] sm:$0xff] }
   0x3   :  { %v1313_v2 = vld [vmem:[%s1767_s2 + $0x38] sm:$0xff]  ;;  %319 = vmatpush.bf16.msra.mxu1 %v1385_v1  ;;  %v1312_v6 = vld [vmem:[%s1767_s2 + $0x30] sm:$0xff]  ;;  %v1311_v10 = vld [vmem:[%s1767_s2 + $0x28] sm:$0xff] }
   0x4   :  { %v1321_v3 = vld [vmem:[%s1767_s2 + $0x78] sm:$0xff]  ;;  %743 = vmatpush.bf16.msra.mxu2 %v1313_v2  ;;  %v1320_v7 = vld [vmem:[%s1767_s2 + $0x70] sm:$0xff]  ;;  %v1319_v11 = vld [vmem:[%s1767_s2 + $0x68] sm:$0xff] }
   0x5   :  { %756 = vmatpush.bf16.msra.mxu3 %v1321_v3  ;;  %v1374_v12 = vld [vmem:[%s1768_s3 + $0x20] sm:$0xff]  ;;  %v1373_v16 = vld [vmem:[%s1768_s3 + $0x18] sm:$0xff]  ;;  %v1372_v20 = vld [vmem:[%s1768_s3 + $0x10] sm:$0xff] }
   0x6   :  { %307 = vmatpush.bf16.msra.mxu0 %v1376_v4  ;;  %v1382_v13 = vld [vmem:[%s1768_s3 + $0x60] sm:$0xff]  ;;  %v1381_v17 = vld [vmem:[%s1768_s3 + $0x58] sm:$0xff]  ;;  %v1380_v22 = vld [vmem:[%s1768_s3 + $0x50] sm:$0xff] }
   0x7   :  { %320 = vmatpush.bf16.msra.mxu1 %v1384_v5  ;;  %v1310_v14 = vld [vmem:[%s1767_s2 + $0x20] sm:$0xff]  ;;  %v1309_v18 = vld [vmem:[%s1767_s2 + $0x18] sm:$0xff]  ;;  %v1308_v25 = vld [vmem:[%s1767_s2 + $0x10] sm:$0xff] }
   0x8   :  { %744 = vmatpush.bf16.msra.mxu2 %v1312_v6  ;;  %v1318_v15 = vld [vmem:[%s1767_s2 + $0x60] sm:$0xff]  ;;  %v1317_v19 = vld [vmem:[%s1767_s2 + $0x58] sm:$0xff]  ;;  %v1316_v26 = vld [vmem:[%s1767_s2 + $0x50] sm:$0xff] }
   0x9   :  { %757 = vmatpush.bf16.msra.mxu3 %v1320_v7  ;;  %v159_v21 = vld [vmem:[%s1766_s1] sm:$0x3]  ;;  %v160_v23 = vld [vmem:[%s1766_s1 + $0x2] sm:$0x3]  ;;  %v161_v24 = vld [vmem:[%s1766_s1 + $0x4] sm:$0x3] }
   0xa   :  { %308 = vmatpush.bf16.msra.mxu0 %v1375_v8  ;;  %v162_v27 = vld [vmem:[%s1766_s1 + $0x6] sm:$0x3]  ;;  %196 = vst [vmem:[#allocation1] ss:$9 sm:$0xff] %v159_v21  ;;  %v1371_v28 = vld [vmem:[%s1768_s3 + $0x8] sm:$0xff]  ;;  %v1329_v35 = vld [vmem:[%s1767_s2 + $0xb8] sm:$0xff] }
   0xb   :  { %321 = vmatpush.bf16.msra.mxu1 %v1383_v9  ;;  %199 = vst [vmem:[#allocation1 + $0x1] ss:$9 sm:$0xff] %v160_v23  ;;  %v1379_v29 = vld [vmem:[%s1768_s3 + $0x48] sm:$0xff]  ;;  %v1370_v32 = vld [vmem:[%s1768_s3] sm:$0xff]  ;;  %v1337_v36 = vld [vmem:[%s1767_s2 + $0xf8] sm:$0xff] }
   0xc   :  { %745 = vmatpush.bf16.msra.mxu2 %v1311_v10  ;;  %202 = vst [vmem:[#allocation1 + $0x2] ss:$9 sm:$0xff] %v161_v24  ;;  %v1307_v30 = vld [vmem:[%s1767_s2 + $0x8] sm:$0xff]  ;;  %v1378_v33 = vld [vmem:[%s1768_s3 + $0x40] sm:$0xff]  ;;  %v1345_v38 = vld [vmem:[%s1767_s2 + $0x138] sm:$0xff] }
   0xd   :  { %758 = vmatpush.bf16.msra.mxu3 %v1319_v11  ;;  %205 = vst [vmem:[#allocation1 + $0x3] ss:$9 sm:$0xff] %v162_v27  ;;  %v1315_v31 = vld [vmem:[%s1767_s2 + $0x48] sm:$0xff]  ;;  %v1306_v34 = vld [vmem:[%s1767_s2] sm:$0xff]  ;;  %v29_v41 = vld [vmem:[%s1765_s0 + $0x10] sm:$0xff] }
   0xe   :  { %309 = vmatpush.bf16.msra.mxu0 %v1374_v12  ;;  %v27_v37 = vld [vmem:[%s1765_s0] sm:$0xff]  ;;  %v28_v40 = vld [vmem:[%s1765_s0 + $0x8] sm:$0xff]  ;;  %v1353_v44 = vld [vmem:[%s1767_s2 + $0x178] sm:$0xff] }
   0xf   :  { %322 = vmatpush.bf16.msra.mxu1 %v1382_v13  ;;  %v1314_v39 = vld [vmem:[%s1767_s2 + $0x40] sm:$0xff]  ;;  %v30_v45 = vld [vmem:[%s1765_s0 + $0x18] sm:$0xff]  ;;  %v1328_v46 = vld [vmem:[%s1767_s2 + $0xb0] sm:$0xff] }
  0x10   :  { %746 = vmatpush.bf16.msra.mxu2 %v1310_v14  ;;  %v1336_v47 = vld [vmem:[%s1767_s2 + $0xf0] sm:$0xff]  ;;  %v1327_v50 = vld [vmem:[%s1767_s2 + $0xa8] sm:$0xff]  ;;  %v1326_v54 = vld [vmem:[%s1767_s2 + $0xa0] sm:$0xff] }
  0x11   :  { %759 = vmatpush.bf16.msra.mxu3 %v1318_v15  ;;  %v1344_v48 = vld [vmem:[%s1767_s2 + $0x130] sm:$0xff]  ;;  %v1335_v51 = vld [vmem:[%s1767_s2 + $0xe8] sm:$0xff]  ;;  %v1334_v55 = vld [vmem:[%s1767_s2 + $0xe0] sm:$0xff] }
  0x12   :  { %310 = vmatpush.bf16.msra.mxu0 %v1373_v16  ;;  %v1352_v49 = vld [vmem:[%s1767_s2 + $0x170] sm:$0xff]  ;;  %v1343_v52 = vld [vmem:[%s1767_s2 + $0x128] sm:$0xff]  ;;  %v1342_v56 = vld [vmem:[%s1767_s2 + $0x120] sm:$0xff] }
  0x13   :  { %323 = vmatpush.bf16.msra.mxu1 %v1381_v17  ;;  %v1351_v53 = vld [vmem:[%s1767_s2 + $0x168] sm:$0xff]  ;;  %v1350_v59 = vld [vmem:[%s1767_s2 + $0x160] sm:$0xff]  ;;  %v1325_v60 = vld [vmem:[%s1767_s2 + $0x98] sm:$0xff] }
  0x14   :  { %747 = vmatpush.bf16.msra.mxu2 %v1309_v18  ;;  %v206_v42 = vld [vmem:[#allocation1] sm:$0xff]  ;;  %v207_v43 = vld [vmem:[#allocation1 + $0x9] sm:$0xff]  ;;  %v1333_v61 = vld [vmem:[%s1767_s2 + $0xd8] sm:$0xff] }
  0x15   :  { %760 = vmatpush.bf16.msra.mxu3 %v1317_v19  ;;  %333 = vst [vmem:[#allocation1] ss:$9 sm:$0xff] %v27_v37  ;;  %v1341_v62 = vld [vmem:[%s1767_s2 + $0x118] sm:$0xff]  ;;  %v1324_v0 = vld [vmem:[%s1767_s2 + $0x90] sm:$0xff]  ;;  %v1323_v4 = vld [vmem:[%s1767_s2 + $0x88] sm:$0xff] }
  0x16   :  { %311 = vmatpush.bf16.msra.mxu0 %v1372_v20  ;;  %336 = vst [vmem:[#allocation1 + $0x1] ss:$9 sm:$0xff] %v28_v40  ;;  %v1349_v63 = vld [vmem:[%s1767_s2 + $0x158] sm:$0xff]  ;;  %v1332_v1 = vld [vmem:[%s1767_s2 + $0xd0] sm:$0xff]  ;;  %v1331_v5 = vld [vmem:[%s1767_s2 + $0xc8] sm:$0xff] }
  0x17   :  { %324 = vmatpush.bf16.msra.mxu1 %v1380_v22  ;;  %339 = vst [vmem:[#allocation1 + $0x2] ss:$9 sm:$0xff] %v29_v41  ;;  %v1340_v2 = vld [vmem:[%s1767_s2 + $0x110] sm:$0xff]  ;;  %v1339_v6 = vld [vmem:[%s1767_s2 + $0x108] sm:$0xff]  ;;  %v1322_v8 = vld [vmem:[%s1767_s2 + $0x80] sm:$0xff] }
  0x18   :  { %748 = vmatpush.bf16.msra.mxu2 %v1308_v25  ;;  %342 = vst [vmem:[#allocation1 + $0x3] ss:$9 sm:$0xff] %v30_v45  ;;  %v1348_v3 = vld [vmem:[%s1767_s2 + $0x150] sm:$0xff]  ;;  %v1347_v7 = vld [vmem:[%s1767_s2 + $0x148] sm:$0xff]  ;;  %v1330_v9 = vld [vmem:[%s1767_s2 + $0xc0] sm:$0xff] }
  0x19   :  { %761 = vmatpush.bf16.msra.mxu3 %v1316_v26  ;;  %v1338_v10 = vld [vmem:[%s1767_s2 + $0x100] sm:$0xff]  ;;  %v1361_v11 = vld [vmem:[%s1767_s2 + $0x1b8] sm:$0xff]  ;;  %v1360_v17 = vld [vmem:[%s1767_s2 + $0x1b0] sm:$0xff] }
  0x1a   :  { %312 = vmatpush.bf16.msra.mxu0 %v1371_v28  ;;  %v1369_v12 = vld [vmem:[%s1767_s2 + $0x1f8] sm:$0xff]  ;;  %v1346_v13 = vld [vmem:[%s1767_s2 + $0x140] sm:$0xff]  ;;  %v1368_v18 = vld [vmem:[%s1767_s2 + $0x1f0] sm:$0xff] }
  0x1b   :  { %325 = vmatpush.bf16.msra.mxu1 %v1379_v29  ;;  %v1359_v20 = vld [vmem:[%s1767_s2 + $0x1a8] sm:$0xff]  ;;  %v1358_v22 = vld [vmem:[%s1767_s2 + $0x1a0] sm:$0xff]  ;;  %v1357_v24 = vld [vmem:[%s1767_s2 + $0x198] sm:$0xff] }
  0x1c   :  { %749 = vmatpush.bf16.msra.mxu2 %v1307_v30  ;;  %v1367_v21 = vld [vmem:[%s1767_s2 + $0x1e8] sm:$0xff]  ;;  %v1366_v23 = vld [vmem:[%s1767_s2 + $0x1e0] sm:$0xff]  ;;  %v1365_v25 = vld [vmem:[%s1767_s2 + $0x1d8] sm:$0xff] }
  0x1d   :  { %762 = vmatpush.bf16.msra.mxu3 %v1315_v31  ;;  %v1356_v26 = vld [vmem:[%s1767_s2 + $0x190] sm:$0xff]  ;;  %v1355_v28 = vld [vmem:[%s1767_s2 + $0x188] sm:$0xff]  ;;  %v1354_v30 = vld [vmem:[%s1767_s2 + $0x180] sm:$0xff] }
  0x1e   :  { %313 = vmatpush.bf16.msra.mxu0 %v1370_v32  ;;  %v1364_v27 = vld [vmem:[%s1767_s2 + $0x1d0] sm:$0xff]  ;;  %v1363_v29 = vld [vmem:[%s1767_s2 + $0x1c8] sm:$0xff]  ;;  %v1362_v31 = vld [vmem:[%s1767_s2 + $0x1c0] sm:$0xff] }
  0x1f   :  { %326 = vmatpush.bf16.msra.mxu1 %v1378_v33  ;;  %v343_v57 = vld [vmem:[#allocation1] sm:$0xff]  ;;  %v344_v58 = vld [vmem:[#allocation1 + $0x9] sm:$0xff]  ;;  %v345_v14 = vld [vmem:[#allocation1 + $0x12] sm:$0xff] }
  0x20   :  { %750 = vmatpush.bf16.msra.mxu2 %v1306_v34  ;;  %v347_v15 = vld [vmem:[#allocation1 + $0x24] sm:$0xff]  ;;  %v346_v16 = vld [vmem:[#allocation1 + $0x1b] sm:$0xff]  ;;  %v348_v19 = vld [vmem:[#allocation1 + $0x2d] sm:$0xff] }
  0x21   :  { %763 = vmatpush.bf16.msra.mxu3 %v1314_v39  ;;  %314 = vmatmul.bf16.vlgmr.msra.gmra.mxu0 %v206_v42  ;;  %v349_v32 = vld [vmem:[#allocation1 + $0x36] sm:$0xff]  ;;  %v350_v33 = vld [vmem:[#allocation1 + $0x3f] sm:$0xff]  ;;  %v1391_v40 = vld [vmem:[%s1770_s5 + $0x28] sm:$0xff] }
  0x22   :  { %769 = vmatpush.bf16.msrb.mxu0 %v1329_v35  ;;  %327 = vmatmul.bf16.vlgmr.msra.gmra.mxu1 %v207_v43  ;;  %v1390_v43 = vld [vmem:[%s1770_s5 + $0x20] sm:$0xff] }
  0x23   :  { %782 = vmatpush.bf16.msrb.mxu1 %v1337_v36  ;;  %751 = vmatmul.bf16.vlgmr.msra.gmra.mxu2 %v343_v57  ;;  %v1393_v36 = vld [vmem:[%s1770_s5 + $0x38] sm:$0xff] }
  0x24   :  { %795 = vmatpush.bf16.msrb.mxu2 %v1345_v38  ;;  %764 = vmatmul.bf16.vlgmr.msra.gmra.mxu3 %v344_v58  ;;  %v1392_v38 = vld [vmem:[%s1770_s5 + $0x30] sm:$0xff] }
  0x25   :  { %808 = vmatpush.bf16.msrb.mxu3 %v1353_v44  ;;  %v1389_v44 = vld [vmem:[%s1770_s5 + $0x18] sm:$0xff] }
  0x26   :  { %770 = vmatpush.bf16.msrb.mxu0 %v1328_v46 }
  0x27   :  { %783 = vmatpush.bf16.msrb.mxu1 %v1336_v47  ;;  %v1388_v47 = vld [vmem:[%s1770_s5 + $0x10] sm:$0xff] }
  0x28   :  { %796 = vmatpush.bf16.msrb.mxu2 %v1344_v48 }
  0x29   :  { %809 = vmatpush.bf16.msrb.mxu3 %v1352_v49  ;;  %v1387_v49 = vld [vmem:[%s1770_s5 + $0x8] sm:$0xff] }
  0x2a   :  { %771 = vmatpush.bf16.msrb.mxu0 %v1327_v50 }
  0x2b   :  { %784 = vmatpush.bf16.msrb.mxu1 %v1335_v51  ;;  %v1386_v51 = vld [vmem:[%s1770_s5] sm:$0xff] }
  0x2c   :  { %797 = vmatpush.bf16.msrb.mxu2 %v1343_v52 }
  0x2d   :  { %810 = vmatpush.bf16.msrb.mxu3 %v1351_v53 }
  0x2e   :  { %772 = vmatpush.bf16.msrb.mxu0 %v1326_v54 }
  0x2f   :  { %785 = vmatpush.bf16.msrb.mxu1 %v1334_v55 }
  0x30   :  { %798 = vmatpush.bf16.msrb.mxu2 %v1342_v56 }
  0x31   :  { %811 = vmatpush.bf16.msrb.mxu3 %v1350_v59 }
  0x32   :  { %773 = vmatpush.bf16.msrb.mxu0 %v1325_v60 }
  0x33   :  { %786 = vmatpush.bf16.msrb.mxu1 %v1333_v61 }
  0x34   :  { %799 = vmatpush.bf16.msrb.mxu2 %v1341_v62 }
  0x35   :  { %812 = vmatpush.bf16.msrb.mxu3 %v1349_v63 }
  0x36   :  { %774 = vmatpush.bf16.msrb.mxu0 %v1324_v0 }
  0x37   :  { %787 = vmatpush.bf16.msrb.mxu1 %v1332_v1 }
  0x38   :  { %800 = vmatpush.bf16.msrb.mxu2 %v1340_v2 }
  0x39   :  { %813 = vmatpush.bf16.msrb.mxu3 %v1348_v3 }
  0x3a   :  { %775 = vmatpush.bf16.msrb.mxu0 %v1323_v4  ;;  %v1397_v4 = vld [vmem:[%s1769_s4] ss:$0 sm:$0xff] }
  0x3b   :  { %788 = vmatpush.bf16.msrb.mxu1 %v1331_v5 }
  0x3c   :  { %801 = vmatpush.bf16.msrb.mxu2 %v1339_v6 }
  0x3d   :  { %814 = vmatpush.bf16.msrb.mxu3 %v1347_v7 }
  0x3e   :  { %776 = vmatpush.bf16.msrb.mxu0 %v1322_v8 }
  0x3f   :  { %789 = vmatpush.bf16.msrb.mxu1 %v1330_v9 }
  0x40   :  { %802 = vmatpush.bf16.msrb.mxu2 %v1338_v10 }
  0x41   :  { %815 = vmatpush.bf16.msrb.mxu3 %v1346_v13  ;;  %777 = vmatmul.bf16.vlgmr.msrb.gmra.mxu0 %v345_v14 }
  0x42   :  { %821 = vmatpush.bf16.msra.mxu0 %v1361_v11  ;;  %790 = vmatmul.bf16.vlgmr.msrb.gmra.mxu1 %v346_v16  ;;  %v1398_v11 = vld [vmem:[%s1771_s6] ss:$0 sm:$0xff] }
  0x43   :  { %834 = vmatpush.bf16.msra.mxu1 %v1369_v12  ;;  %803 = vmatmul.bf16.vlgmr.msrb.gmra.mxu2 %v347_v15 }
  0x44   :  { %816 = vmatmul.bf16.vlgmr.msrb.gmra.mxu3 %v348_v19  ;;  %922 = vmatpush.bf16.msra.mxu2 %v1393_v36 }
  0x46   :  { %822 = vmatpush.bf16.msra.mxu0 %v1360_v17 }
  0x47   :  { %835 = vmatpush.bf16.msra.mxu1 %v1368_v18 }
  0x48   :  { %923 = vmatpush.bf16.msra.mxu2 %v1392_v38 }
  0x4a   :  { %823 = vmatpush.bf16.msra.mxu0 %v1359_v20 }
  0x4b   :  { %836 = vmatpush.bf16.msra.mxu1 %v1367_v21 }
  0x4c   :  { %924 = vmatpush.bf16.msra.mxu2 %v1391_v40 }
  0x4e   :  { %824 = vmatpush.bf16.msra.mxu0 %v1358_v22 }
  0x4f   :  { %837 = vmatpush.bf16.msra.mxu1 %v1366_v23 }
  0x50   :  { %925 = vmatpush.bf16.msra.mxu2 %v1390_v43 }
  0x52   :  { %825 = vmatpush.bf16.msra.mxu0 %v1357_v24 }
  0x53   :  { %838 = vmatpush.bf16.msra.mxu1 %v1365_v25 }
  0x54   :  { %926 = vmatpush.bf16.msra.mxu2 %v1389_v44 }
  0x56   :  { %826 = vmatpush.bf16.msra.mxu0 %v1356_v26 }
  0x57   :  { %839 = vmatpush.bf16.msra.mxu1 %v1364_v27 }
  0x58   :  { %927 = vmatpush.bf16.msra.mxu2 %v1388_v47 }
  0x5a   :  { %827 = vmatpush.bf16.msra.mxu0 %v1355_v28 }
  0x5b   :  { %840 = vmatpush.bf16.msra.mxu1 %v1363_v29 }
  0x5c   :  { %928 = vmatpush.bf16.msra.mxu2 %v1387_v49 }
  0x5e   :  { %828 = vmatpush.bf16.msra.mxu0 %v1354_v30 }
  0x5f   :  { %841 = vmatpush.bf16.msra.mxu1 %v1362_v31 }
  0x60   :  { %929 = vmatpush.bf16.msra.mxu2 %v1386_v51 }
  0x61   :  { %829 = vmatmul.bf16.vlgmr.msra.gmra.mxu0 %v349_v32 }
  0x62   :  { %842 = vmatmul.bf16.vlgmr.msra.gmra.mxu1 %v350_v33 }
  0x9e   :  { %v315_v34 = vpop.f32.mrf.mxu0 }
  0x9f   :  { %v328_v35 = vpop.f32.mrf.mxu1 }
  0xa0   :  { %v329_v52 = vadd.f32 %v328_v35, %v315_v34 }
  0xa6   :  { %v317_v37 = vpop.f32.mrf.mxu0  ;;  %v752_v41 = vpop.f32.mrf.mxu2 }
  0xa7   :  { %v330_v39 = vpop.f32.mrf.mxu1  ;;  %v765_v42 = vpop.f32.mrf.mxu3  ;;  %v753_v55 = vadd.f32 %v752_v41, %v329_v52 }
  0xa9   :  { %v766_v58 = vadd.f32 %v765_v42, %v753_v55 }
  0xae   :  { %v754_v45 = vpop.f32.mrf.mxu2 }
  0xaf   :  { %v767_v46 = vpop.f32.mrf.mxu3 }
  0xbe   :  { %v778_v48 = vpop.f32.mrf.mxu0 }
  0xbf   :  { %v791_v50 = vpop.f32.mrf.mxu1  ;;  %v779_v60 = vadd.f32 %v778_v48, %v766_v58 }
  0xc1   :  { %v792_v62 = vadd.f32 %v791_v50, %v779_v60 }
  0xc6   :  { %v804_v53 = vpop.f32.mrf.mxu2  ;;  %v780_v54 = vpop.f32.mrf.mxu0 }
  0xc7   :  { %v793_v56 = vpop.f32.mrf.mxu1  ;;  %v817_v57 = vpop.f32.mrf.mxu3  ;;  %v805_v63 = vadd.f32 %v804_v53, %v792_v62 }
  0xc9   :  { %v818_v0 = vadd.f32 %v817_v57, %v805_v63 }
  0xce   :  { %v806_v59 = vpop.f32.mrf.mxu2 }
  0xcf   :  { %v819_v61 = vpop.f32.mrf.mxu3 }
  0xde   :  { %v830_v1 = vpop.f32.mrf.mxu0 }
  0xdf   :  { %v843_v2 = vpop.f32.mrf.mxu1  ;;  %v831_v3 = vadd.f32 %v830_v1, %v818_v0 }
  0xe1   :  { %v844_v5 = vadd.f32 %v843_v2, %v831_v3 }
  0xe3   :  { %v851_v6 = vadd.f32 %v1397_v4, %v844_v5 }
  0xe5   :  { %v852_v7 = vmax.f32 %v851_v6, 0.0 }
  0xe6   :  { %v832_v8 = vpop.f32.mrf.mxu0 }
  0xe7   :  { %v845_v9 = vpop.f32.mrf.mxu1  ;;  %v853_v10 = vpack.c.bf16 %v852_v7, %v852_v7 }
  0xe9   :  { %930 = vmatmul.bf16.vlgmr.msra.gmra.mxu2 %v853_v10 }
 0x16c   :  { %v931_v12 = vpop.f32.mrf.mxu2 }
 0x16d   :  { %v932_v13 = vadd.f32 %v1398_v11, %v931_v12 }
 0x16f   :  { %935 = vst [vmem:[#allocation2] sm:$0xff] %v932_v13 }
 0x174   :  { %v933_v14 = vpop.f32.mrf.mxu2 }
 0x175   :  { %939 = vsyncadd [#allocation3], 96  ;;  %s942_s4 = sshll.u32 %s1772_s7, 4  ;;  %s1425_s21 = smov [#allocation2]   ;;  %s943_s4 = int_to_ptr.hbm [resolvable:$true] %s942_s4 }
 0x176   :  { %s940_s22 = sshll.u32 %s1425_s21, 4  ;;  %s1426_s0 = smov 32   ;;  %s941_s22 = int_to_ptr.vmem [resolvable:$true] %s940_s22 }
 0x177   :  { %s1427_s23 = smov 2  }
 0x178   :  { %948 = dma.vmem_to_hbm [thread:$0]  %s941_s22, 32, %s943_s4, [#allocation3], %s1426_s0, %s1426_s0, %s1427_s23  }
 0x179   :  { %1423 = dma.done.wait [#allocation3], 128  }
 0x17a   :  { %1424 = vsyncadd [#allocation3], 4294967168 }
 0x17b   :  { %953 = vsyncpa [#allocation3], 1 }

</bundles_post_ra>
